<compile_context>
chip_gen: v5e
topology: v5e:2x2
jax: 0.10.0
libtpu: 0.0.40
codegen_flags: <defaults>
</compile_context>

<pallas_src>
import jax
import jax.numpy as jnp
from jax import lax
from jax.experimental import pallas as pl
from jax.experimental.pallas import tpu as pltpu


def _cdiv(a, b):
    return -(-a // b)


def _make_kernel(*, tb, tt, lane, g, C, chunk):
    assert tt % chunk == 0
    n_chunks = tt // chunk

    def kernel(x_ref, o_ref, num_ref, den_ref):
        # x_ref: (tb, tt, lane) tile;  o_ref: (tb, C);  scratch: (tb, lane) f32.
        t = pl.program_id(1)

        @pl.when(t == 0)
        def _init():
            num_ref[...] = jnp.zeros_like(num_ref)
            den_ref[...] = jnp.zeros_like(den_ref)

        def accum_chunk(xc):
            xc = xc.astype(jnp.float32)                 # (tb, chunk, lane)
            num_ref[...] += jnp.sum(xc * xc, axis=1)    # (tb, lane)
            den_ref[...] += jnp.sum(xc, axis=1)         # (tb, lane)

        if n_chunks == 1:
            accum_chunk(x_ref[...])
        else:
            def body(i, carry):
                start = pl.multiple_of(i * chunk, chunk)
                accum_chunk(x_ref[:, pl.ds(start, chunk), :])
                return carry

            lax.fori_loop(0, n_chunks, body, 0, unroll=n_chunks <= 8)

        @pl.when(t == pl.num_programs(1) - 1)
        def _finalize():
            num = num_ref[...]
            den = den_ref[...]
            if g > 1:
                # Fold the g lane-groups back down to C lanes (static lane
                # slices; one-time XLU cost per batch block).
                num_f = num[:, 0:C]
                den_f = den[:, 0:C]
                for j in range(1, g):
                    num_f = num_f + num[:, j * C:(j + 1) * C]
                    den_f = den_f + den[:, j * C:(j + 1) * C]
                num, den = num_f, den_f
            # EUP approximate reciprocal + one Newton-Raphson step -> ~f32
            # accuracy while keeping the divide off the VPU slot.
            r = pl.reciprocal(den, approx=True)
            r = r * (2.0 - den * r)
            o_ref[...] = (num * r).astype(o_ref.dtype)

    return kernel


def _choose_batch_tile(B, itemsize):
    # Sublane-dense candidates; keep the (tb, C) output block layout-legal
    # (tb a multiple of 8, or tb == B).  Prefer >= 2 batch blocks so v7x's
    # second TensorCore has work.
    cands = (16, 8) if itemsize <= 2 else (8,)
    for tb in cands:
        if B % tb == 0 and B // tb >= 2:
            return tb
    for tb in cands:
        if B % tb == 0:
            return tb
    return B


def _choose_chunk(tt):
    if tt <= 512:
        return tt
    for ck in (512, 384, 256, 128, 64, 32, 16, 8):
        if tt % ck == 0:
            return ck
    return tt


def linear_softmax(
    time_decision: jax.Array,
    *,
    batch_block=None,
    t_block=None,
    chunk_rows=None,
    target_block_bytes=6 * 1024 * 1024,
) -> jax.Array:
    """Pallas TPU implementation of (x**2).sum(1) / x.sum(1) for x of shape (B, T, C)."""
    x = time_decision
    B, T, C = x.shape
    out_dtype = x.dtype
    itemsize = jnp.dtype(x.dtype).itemsize

    # ---- Lane-density fold: (B, T, C) -> (B, T_f, g*C), g = 128 // C. -------
    g = 128 // C if (C < 128 and 128 % C == 0) else 1
    lane = g * C

    # ---- Batch tile. ---------------------------------------------------------
    tb = batch_block if batch_block is not None else _choose_batch_tile(B, itemsize)
    assert B % tb == 0 and (tb % 8 == 0 or tb == B), (B, tb)

    # ---- T tile (in folded-row units); pad T with zeros if needed (neutral). -
    T_f_min = _cdiv(T, g)
    rows_target = max(8, (target_block_bytes // max(1, tb * lane * itemsize)) // 8 * 8)

    if t_block is not None:
        tt = t_block
        T_f = _cdiv(T_f_min, tt) * tt
    elif T_f_min <= rows_target:
        tt = T_f_min
        T_f = T_f_min
    else:
        n_blocks = _cdiv(T_f_min, rows_target)
        tt = _cdiv(_cdiv(T_f_min, n_blocks), 8) * 8
        T_f = n_blocks * tt
    assert T_f % tt == 0 and (tt % 8 == 0 or tt == T_f), (T, T_f, tt)

    T_total = T_f * g
    if T_total != T:
        # Zero padding adds 0 to both numerator and denominator -> exact.
        x = jnp.pad(x, ((0, 0), (0, T_total - T), (0, 0)))
    x = x.reshape(B, T_f, lane)  # contiguous merge -> free (no HBM copy)

    chunk = chunk_rows if chunk_rows is not None else _choose_chunk(tt)
    assert tt % chunk == 0, (tt, chunk)

    grid = (B // tb, T_f // tt)
    kernel = _make_kernel(tb=tb, tt=tt, lane=lane, g=g, C=C, chunk=chunk)

    return pl.pallas_call(
        kernel,
        out_shape=jax.ShapeDtypeStruct((B, C), out_dtype),
        grid=grid,
        in_specs=[pl.BlockSpec((tb, tt, lane), lambda b, t: (b, t, 0))],
        out_specs=pl.BlockSpec((tb, C), lambda b, t: (b, 0)),
        scratch_shapes=[
            pltpu.VMEM((tb, lane), jnp.float32),   # running sum of x**2
            pltpu.VMEM((tb, lane), jnp.float32),   # running sum of x
        ],
        compiler_params=pltpu.CompilerParams(
            dimension_semantics=("parallel", "arbitrary"),
            vmem_limit_bytes=48 * 1024 * 1024,
        ),
    )(x)


def linear_softmax_ref(x: jax.Array) -> jax.Array:
    # Pure-JAX reference (mirrors the PyTorch forward exactly).
    return jnp.sum(x * x, axis=1) / jnp.sum(x, axis=1)


if __name__ == "__main__":
    key = jax.random.PRNGKey(0)

    # Case 1: small natural shape, exercises the lane-density fold (C=32 -> g=4).
    # Positive (softplus) inputs keep the denominator well-conditioned, matching
    # the module's intended use on probability-like time decisions.
    B, T, C = 2, 8, 32
    x = jax.nn.softplus(jax.random.normal(key, (B, T, C), dtype=jnp.float32))
    out = jax.block_until_ready(linear_softmax(x))
    ref = linear_softmax_ref(x)
    assert out.shape == (B, C), out.shape
    assert jnp.allclose(out, ref, atol=1e-5, rtol=1e-4), "mismatch vs reference (case 1)"

    # Case 2: tiled-T accumulation + chunked inner loop (grid=(2,4), 2 chunks/tile).
    B2, T2, C2 = 16, 64, 128
    x2 = jax.nn.softplus(
        jax.random.normal(jax.random.PRNGKey(1), (B2, T2, C2), dtype=jnp.float32)
    )
    out2 = jax.block_until_ready(
        linear_softmax(x2, batch_block=8, t_block=16, chunk_rows=8)
    )
    ref2 = linear_softmax_ref(x2)
    assert out2.shape == (B2, C2), out2.shape
    assert jnp.allclose(out2, ref2, atol=1e-5, rtol=1e-4), "mismatch vs reference (case 2)"

    # Case 3: T not a multiple of the fold factor -> zero-padding path (exact).
    B3, T3, C3 = 4, 50, 32
    x3 = jax.nn.softplus(
        jax.random.normal(jax.random.PRNGKey(2), (B3, T3, C3), dtype=jnp.float32)
    )
    out3 = jax.block_until_ready(linear_softmax(x3))
    ref3 = linear_softmax_ref(x3)
    assert out3.shape == (B3, C3), out3.shape
    assert jnp.allclose(out3, ref3, atol=1e-5, rtol=1e-4), "mismatch vs reference (case 3)"

    print("KERNEL_OK")
</pallas_src>

<mosaic_0001>
module attributes {stable_mosaic.version = 11 : i64} {
  func.func @kernel(%arg0: i32, %arg1: i32, %arg2: memref<2x2x128xf32, #tpu.memory_space<vmem>>, %arg3: memref<2x32xf32, #tpu.memory_space<vmem>>, %arg4: memref<2x128xf32, #tpu.memory_space<vmem>>, %arg5: memref<2x128xf32, #tpu.memory_space<vmem>>) attributes {dimension_semantics = [#tpu.dimension_semantics<parallel>, #tpu.dimension_semantics<arbitrary>], iteration_bounds = array<i64: 1, 1>, scalar_prefetch = 0 : i64, scratch_operands = 2 : i64, tpu.core_type = #tpu.core_type<tc>, window_params = [{transform_indices = @transform_0, window_bounds = array<i64: 2, 2, 128>}, {transform_indices = @transform_1, window_bounds = array<i64: 2, 32>}]} {
    %c0_i32 = arith.constant 0 : i32
    %0 = arith.cmpi eq, %arg1, %c0_i32 : i32
    %1 = arith.extui %0 : i1 to i32
    %c0_i32_0 = arith.constant 0 : i32
    %2 = arith.cmpi ne, %1, %c0_i32_0 : i32
    scf.if %2 {
      %cst_14 = arith.constant 0.000000e+00 : f32
      %16 = vector.broadcast %cst_14 : f32 to vector<2x128xf32>
      %c0_15 = arith.constant 0 : index
      %c0_16 = arith.constant 0 : index
      %17 = vector.load %arg4[%c0_15, %c0_16] : memref<2x128xf32, #tpu.memory_space<vmem>>, vector<2x128xf32>
      tpu.vector_store %arg4[%c0_15, %c0_16], %16 {strides = array<i32>} : memref<2x128xf32, #tpu.memory_space<vmem>>, vector<2x128xf32>,
      %cst_17 = arith.constant 0.000000e+00 : f32
      %18 = vector.broadcast %cst_17 : f32 to vector<2x128xf32>
      %c0_18 = arith.constant 0 : index
      %c0_19 = arith.constant 0 : index
      %19 = vector.load %arg5[%c0_18, %c0_19] : memref<2x128xf32, #tpu.memory_space<vmem>>, vector<2x128xf32>
      tpu.vector_store %arg5[%c0_18, %c0_19], %18 {strides = array<i32>} : memref<2x128xf32, #tpu.memory_space<vmem>>, vector<2x128xf32>,
    } else {
    }
    %c0 = arith.constant 0 : index
    %c0_1 = arith.constant 0 : index
    %c0_2 = arith.constant 0 : index
    %3 = vector.load %arg2[%c0, %c0_1, %c0_2] : memref<2x2x128xf32, #tpu.memory_space<vmem>>, vector<2x2x128xf32>
    %c0_3 = arith.constant 0 : index
    %c0_4 = arith.constant 0 : index
    %4 = vector.load %arg4[%c0_3, %c0_4] : memref<2x128xf32, #tpu.memory_space<vmem>>, vector<2x128xf32>
    %5 = arith.mulf %3, %3 : vector<2x2x128xf32>
    %cst = arith.constant dense<0.000000e+00> : vector<2x128xf32>
    %6 = vector.multi_reduction <add>, %5, %cst [1] : vector<2x2x128xf32> to vector<2x128xf32>
    %7 = arith.addf %4, %6 : vector<2x128xf32>
    %c0_5 = arith.constant 0 : index
    %c0_6 = arith.constant 0 : index
    %8 = vector.load %arg4[%c0_5, %c0_6] : memref<2x128xf32, #tpu.memory_space<vmem>>, vector<2x128xf32>
    tpu.vector_store %arg4[%c0_5, %c0_6], %7 {strides = array<i32>} : memref<2x128xf32, #tpu.memory_space<vmem>>, vector<2x128xf32>,
    %c0_7 = arith.constant 0 : index
    %c0_8 = arith.constant 0 : index
    %9 = vector.load %arg5[%c0_7, %c0_8] : memref<2x128xf32, #tpu.memory_space<vmem>>, vector<2x128xf32>
    %cst_9 = arith.constant dense<0.000000e+00> : vector<2x128xf32>
    %10 = vector.multi_reduction <add>, %3, %cst_9 [1] : vector<2x2x128xf32> to vector<2x128xf32>
    %11 = arith.addf %9, %10 : vector<2x128xf32>
    %c0_10 = arith.constant 0 : index
    %c0_11 = arith.constant 0 : index
    %12 = vector.load %arg5[%c0_10, %c0_11] : memref<2x128xf32, #tpu.memory_space<vmem>>, vector<2x128xf32>
    tpu.vector_store %arg5[%c0_10, %c0_11], %11 {strides = array<i32>} : memref<2x128xf32, #tpu.memory_space<vmem>>, vector<2x128xf32>,
    %c0_i32_12 = arith.constant 0 : i32
    %13 = arith.cmpi eq, %arg1, %c0_i32_12 : i32
    %14 = arith.extui %13 : i1 to i32
    %c0_i32_13 = arith.constant 0 : i32
    %15 = arith.cmpi ne, %14, %c0_i32_13 : i32
    scf.if %15 {
      %c0_14 = arith.constant 0 : index
      %c0_15 = arith.constant 0 : index
      %16 = vector.load %arg4[%c0_14, %c0_15] : memref<2x128xf32, #tpu.memory_space<vmem>>, vector<2x128xf32>
      %c0_16 = arith.constant 0 : index
      %c0_17 = arith.constant 0 : index
      %17 = vector.load %arg5[%c0_16, %c0_17] : memref<2x128xf32, #tpu.memory_space<vmem>>, vector<2x128xf32>
      %18 = vector.extract_strided_slice %16 {offsets = [0, 0], sizes = [2, 32], strides = [1, 1]} : vector<2x128xf32> to vector<2x32xf32>
      %19 = vector.extract_strided_slice %17 {offsets = [0, 0], sizes = [2, 32], strides = [1, 1]} : vector<2x128xf32> to vector<2x32xf32>
      %20 = vector.extract_strided_slice %16 {offsets = [0, 32], sizes = [2, 32], strides = [1, 1]} : vector<2x128xf32> to vector<2x32xf32>
      %21 = arith.addf %18, %20 : vector<2x32xf32>
      %22 = vector.extract_strided_slice %17 {offsets = [0, 32], sizes = [2, 32], strides = [1, 1]} : vector<2x128xf32> to vector<2x32xf32>
      %23 = arith.addf %19, %22 : vector<2x32xf32>
      %24 = vector.extract_strided_slice %16 {offsets = [0, 64], sizes = [2, 32], strides = [1, 1]} : vector<2x128xf32> to vector<2x32xf32>
      %25 = arith.addf %21, %24 : vector<2x32xf32>
      %26 = vector.extract_strided_slice %17 {offsets = [0, 64], sizes = [2, 32], strides = [1, 1]} : vector<2x128xf32> to vector<2x32xf32>
      %27 = arith.addf %23, %26 : vector<2x32xf32>
      %28 = vector.extract_strided_slice %16 {offsets = [0, 96], sizes = [2, 32], strides = [1, 1]} : vector<2x128xf32> to vector<2x32xf32>
      %29 = arith.addf %25, %28 : vector<2x32xf32>
      %30 = vector.extract_strided_slice %17 {offsets = [0, 96], sizes = [2, 32], strides = [1, 1]} : vector<2x128xf32> to vector<2x32xf32>
      %31 = arith.addf %27, %30 : vector<2x32xf32>
      %32 = tpu.reciprocal %31 {approx = true} : vector<2x32xf32> -> vector<2x32xf32>
      %33 = arith.mulf %31, %32 : vector<2x32xf32>
      %cst_18 = arith.constant 2.000000e+00 : f32
      %34 = vector.broadcast %cst_18 : f32 to vector<2x32xf32>
      %35 = arith.subf %34, %33 : vector<2x32xf32>
      %36 = arith.mulf %32, %35 : vector<2x32xf32>
      %37 = arith.mulf %29, %36 : vector<2x32xf32>
      %c0_19 = arith.constant 0 : index
      %c0_20 = arith.constant 0 : index
      %38 = vector.load %arg3[%c0_19, %c0_20] : memref<2x32xf32, #tpu.memory_space<vmem>>, vector<2x32xf32>
      tpu.vector_store %arg3[%c0_19, %c0_20], %37 {strides = array<i32>} : memref<2x32xf32, #tpu.memory_space<vmem>>, vector<2x32xf32>,
    } else {
    }
    return
  }
  func.func @transform_0(%arg0: i32, %arg1: i32) -> (i32, i32, i32) {
    %c0_i32 = arith.constant 0 : i32
    %c0_i32_0 = arith.constant 0 : i32
    return %arg0, %arg1, %c0_i32 : i32, i32, i32
  }
  func.func @transform_1(%arg0: i32, %arg1: i32) -> (i32, i32) {
    %c0_i32 = arith.constant 0 : i32
    %c0_i32_0 = arith.constant 0 : i32
    return %arg0, %c0_i32 : i32, i32
  }
}

</mosaic_0001>

<bundles_post_ra>
// kernel: tpu_custom_call.1
= control target key start
LH: loop header
LB: loop body
LE: loop exit
PB: predicated region body
PF: predicated region fallthrough
CT: control target
= control target key end

     0   :  { %6 = vsyncpa [#allocation5], 0  ;;  %s222_s0 = inlined_call_operand.hbm [shape: f32[2,2,128], index: 0, kind: input, shape index: {}]   ;;  %s223_s1 = inlined_call_operand.hbm [shape: f32[2,32], index: 1, kind: output, shape index: {}]  }
   0x1   :  { %7 = vsyncpa [#allocation6], 0  ;;  %s12_s8 = sshll.u32 %s222_s0, 4  ;;  %s195_s9 = smov [#allocation4]   ;;  %s13_s8 = int_to_ptr.hbm [resolvable:$true] %s12_s8 }
   0x2   :  { %s14_s10 = sshll.u32 %s195_s9, 4  ;;  %s196_s11 = smov 32   ;;  %s15_s10 = int_to_ptr.vmem [resolvable:$true] %s14_s10 }
   0x3   :  { %s197_s12 = smov 2  }
   0x4   :  { %20 = dma.hbm_to_vmem [thread:$0]  %s13_s8, 64, %s15_s10, [#allocation5], %s196_s11, %s196_s11, %s197_s12  }
   0x5   :  { %191 = dma.done.wait [#allocation5], 64  }
   0x6   :  { %192 = vsyncadd [#allocation5], 4294967232  ;;  %v198_v0 = vmov 0.0   ;;  %vm36_vm0 = vcmask 1041408   ;;  %v31_v1 = vld [vmem:[#allocation4] sm:$0x3] }
   0x7   :  { %29 = vst [vmem:[#allocation2] sm:$0x3] %v198_v0  ;;  %v32_v2 = vld [vmem:[#allocation4 + $0x2] sm:$0x3]  ;;  %v59_v3 = vsel %vm36_vm0, %v31_v1, 0.0  ;;  %v34_v5 = vmul.f32 %v31_v1, %v31_v1  ;;  %vm53_vm1 = vcmask 1041409  }
   0x8   :  { %30 = vst [vmem:[#allocation3] sm:$0x3] %v198_v0  ;;  %v66_v4 = vsel %vm36_vm0, %v32_v2, 0.0  ;;  %v35_v6 = vmul.f32 %v32_v2, %v32_v2  ;;  %v60_v7 = vrot.slane %v59_v3, 4  ;;  %s199_s0 = smov 96   ;;  %s200_s13 = smov 64  }
   0x9   :  { %v67_v8 = vrot.slane %v66_v4, 4  ;;  %v37_v9 = vsel %vm36_vm0, %v34_v5, 0.0  ;;  %s201_s14 = smov [#allocation7]   ;;  %s124_s18 = sshll.u32 %s223_s1, 4  ;;  %vm115_vm2 = vcmask 254976   ;;  %s125_s18 = int_to_ptr.hbm [resolvable:$true] %s124_s18 }
   0xa   :  { %v44_v10 = vsel %vm36_vm0, %v35_v6, 0.0  ;;  %v61_v11 = vadd.f32 %v60_v7, %v59_v3  ;;  %v38_v13 = vrot.slane %v37_v9, 4  ;;  %s122_s15 = sshll.u32 %s201_s14, 4  ;;  %s123_s15 = int_to_ptr.vmem [resolvable:$true] %s122_s15 }
   0xb   :  { %v68_v12 = vadd.f32 %v67_v8, %v66_v4  ;;  %v45_v14 = vrot.slane %v44_v10, 4 }
   0xc   :  { %v62_v15 = vrot.slane %v61_v11, 2  ;;  %v39_v17 = vadd.f32 %v38_v13, %v37_v9 }
   0xd   :  { %v69_v16 = vrot.slane %v68_v12, 2  ;;  %v46_v18 = vadd.f32 %v45_v14, %v44_v10 }
   0xe   :  { %v63_v19 = vadd.f32 %v62_v15, %v61_v11  ;;  %v40_v21 = vrot.slane %v39_v17, 2  ;;  %v33_v33 = vld [vmem:[#allocation2] sm:$0x3] }
   0xf   :  { %v70_v20 = vadd.f32 %v69_v16, %v68_v12  ;;  %v47_v22 = vrot.slane %v46_v18, 2  ;;  %v58_v27 = vld [vmem:[#allocation3] sm:$0x3] }
  0x10   :  { %v64_v23 = vrot.slane %v63_v19, 1  ;;  %v41_v25 = vadd.f32 %v40_v21, %v39_v17 }
  0x11   :  { %v71_v24 = vrot.slane %v70_v20, 1  ;;  %v48_v26 = vadd.f32 %v47_v22, %v46_v18 }
  0x12   :  { %v65_v28 = vadd.f32 %v64_v23, %v63_v19  ;;  %v42_v30 = vrot.slane %v41_v25, 1 }
  0x13   :  { %v72_v29 = vadd.f32 %v71_v24, %v70_v20  ;;  %v49_v31 = vrot.slane %v48_v26, 1 }
  0x14   :  { %v43_v34 = vadd.f32 %v42_v30, %v41_v25 }
  0x15   :  { %v75_v32 = vsel %vm53_vm1, %v72_v29, %v65_v28  ;;  %v50_v35 = vadd.f32 %v49_v31, %v48_v26 }
  0x16   :  { %v77_v36 = vadd.f32 %v75_v32, %v58_v27 }
  0x17   :  { %v54_v37 = vsel %vm53_vm1, %v50_v35, %v43_v34 }
  0x18   :  { %78 = vst [vmem:[#allocation3] sm:$0x3] %v77_v36  ;;  %v56_v38 = vadd.f32 %v54_v37, %v33_v33 }
  0x1a   :  { %57 = vst [vmem:[#allocation2] sm:$0x3] %v56_v38 }
  0x1f   :  { %v83_v39 = vld [vmem:[#allocation3] sm:$0x3] }
  0x20   :  { %90 = vrot.lane.b32.xlu0 %v83_v39, %s199_s0  ;;  %106 = vrot.lane.b32.xlu1 %v83_v39, %s196_s11 }
  0x21   :  { %v82_v40 = vld [vmem:[#allocation2] sm:$0x3] }
  0x22   :  { %94 = vrot.lane.b32.xlu2 %v82_v40, %s200_s13 }
  0x28   :  { %98 = vrot.lane.b32.xlu0 %v83_v39, %s200_s13  ;;  %85 = vrot.lane.b32.xlu1 %v82_v40, %s199_s0 }
  0x2a   :  { %102 = vrot.lane.b32.xlu2 %v82_v40, %s196_s11 }
  0x7c   :  { %v95_v47 = vpop.permute.xlu2 %94 }
  0x84   :  { %v103_v53 = vpop.permute.xlu2 %102 }
  0x92   :  { %v91_v41 = vpop.permute.xlu0 %90  ;;  %v107_v42 = vpop.permute.xlu1 %106 }
  0x93   :  { %v93_v43 = vadd.f32 %v91_v41, %v83_v39 }
  0x9a   :  { %v99_v44 = vpop.permute.xlu0 %98  ;;  %v86_v48 = vpop.permute.xlu1 %85 }
  0x9b   :  { %v101_v45 = vadd.f32 %v99_v44, %v93_v43  ;;  %v88_v49 = vadd.f32 %v86_v48, %v82_v40 }
  0x9d   :  { %v109_v46 = vadd.f32 %v107_v42, %v101_v45  ;;  %v97_v52 = vadd.f32 %v95_v47, %v88_v49 }
  0x9f   :  { %141 = vrcp.f32 %v109_v46  ;;  %v105_v56 = vadd.f32 %v103_v53, %v97_v52 }
  0xa5   :  { %v142_v50 = vpop.eup %141 }
  0xa6   :  { %v111_v51 = vmul.f32 %v142_v50, %v109_v46 }
  0xa8   :  { %v112_v54 = vsub.f32 2.0, %v111_v51 }
  0xaa   :  { %v113_v55 = vmul.f32 %v142_v50, %v112_v54 }
  0xac   :  { %v114_v57 = vmul.f32 %v113_v55, %v105_v56 }
  0xae   :  { %116 = vst.msk [vmem:[#allocation7] sm:$0x3] %vm115_vm2, %v114_v57 }
  0xaf   :  { %127 = dma.vmem_to_hbm [thread:$0]  %s123_s15, 32, %s125_s18, [#allocation6]  }
  0xb0   :  { %193 = dma.done.wait [#allocation6], 32  }
  0xb1   :  { %194 = vsyncadd [#allocation6], 4294967264 }
  0xb2   :  { %132 = vsyncpa [#allocation5], 1 }
  0xb3   :  { %133 = vsyncpa [#allocation6], 1 }

</bundles_post_ra>
